<compile_context>
chip_gen: v7x
topology: tpu7x:2x2x1
jax: 0.10.0
libtpu: 0.0.40
codegen_flags: <defaults>
</compile_context>

<pallas_src>
import functools

import jax
import jax.numpy as jnp
from jax.experimental import pallas as pl
from jax.experimental.pallas import tpu as pltpu


def _reorg_copy_kernel(x_ref, o_ref, *, stride, sC):
    # x_ref: (TR, stride, Wo, stride*C) -- rows r = b*Ho + h2, lanes already
    #                                       grouped as (w2, wr*C + c)
    # o_ref: (TR, Wo, stride*stride*C)
    # Output channel co = hr*(s*C) + (wr*C + c): each hr lands in a contiguous
    # lane slice of the output block -> body is pure vld/vst, no relayout.
    for hr in range(stride):                              # static, unrolled
        o_ref[:, :, hr * sC:(hr + 1) * sC] = x_ref[:, hr, :, :]


def _tpu_vmem_capacity_bytes(default=128 * 1024 * 1024):
    """Best-effort VMEM capacity query (falls back to 128 MiB = v5e/v6e)."""
    try:
        info = pltpu.get_tpu_info()
        return int(getattr(info, "vmem_capacity_bytes", default))
    except Exception:
        return default


def _choose_block_rows(num_rows, row_bytes, target_bytes, min_steps=8):
    """Rows per grid step.

    Largest row count whose block stays near target_bytes while still leaving
    at least min(num_rows, min_steps) grid steps, so the DMA pipeline has
    iterations to overlap and the parallel axis can be sharded across
    TensorCores.  No divisibility requirement (grid uses cdiv; Pallas clips
    the boundary block).
    """
    by_bytes = max(1, target_bytes // max(1, row_bytes))
    by_steps = max(1, int(pl.cdiv(num_rows, min_steps)))
    return int(max(1, min(num_rows, by_bytes, by_steps)))


def reorg_nhwc(x_nhwc, stride=2, *, target_block_bytes=None):
    """NHWC-native (transpose-free) darknet Reorg.

    x_nhwc: (B, H, W, C) -> (B, H//s, W//s, s*s*C) with
      out[b, h2, w2, (hr*s + wr)*C + c] = x[b, h2*s + hr, w2*s + wr, c]
    """
    B, H, W, C = x_nhwc.shape
    s = int(stride)
    assert H % s == 0 and W % s == 0
    Ho, Wo = H // s, W // s
    sC = s * C
    Co = s * sC
    itemsize = jnp.dtype(x_nhwc.dtype).itemsize

    # Chip-aware sizing: v7x-class parts have 64 MiB VMEM/TC and ~3.2 TB/s
    # HBM -> larger blocks under a tighter VMEM cap; v5e/v6e keep ~3 MiB
    # blocks (already ~HBM roofline there).
    vmem_cap = _tpu_vmem_capacity_bytes()
    small_vmem = vmem_cap <= 64 * 1024 * 1024
    vmem_ceiling = min((vmem_cap * 3) // 4, 64 * 1024 * 1024)  # never ask for all of VMEM
    if target_block_bytes is None:
        target_block_bytes = (6 << 20) if small_vmem else (3 << 20)
    # Keep the double-buffered (in + out) footprint under the ceiling.
    target_block_bytes = max(1, min(int(target_block_bytes),
                                    (vmem_ceiling - (4 << 20)) // 4))

    # Free row-major relabels: flatten (B, Ho) into one "row" axis.
    #   input : (B, H, W, C)      -> (B*Ho, s, Wo, s*C)
    #   output: (B*Ho, Wo, s*s*C) -> (B, Ho, Wo, s*s*C)
    R = B * Ho
    x_flat = x_nhwc.reshape(R, s, Wo, sC)

    row_bytes = s * Wo * sC * itemsize              # bytes per row (in == out)
    TR = _choose_block_rows(R, row_bytes, target_block_bytes)
    block_bytes = TR * row_bytes
    num_steps = int(pl.cdiv(R, TR))

    vmem_limit = int(min(max(32 * 1024 * 1024, 4 * block_bytes + (4 << 20)),
                         vmem_ceiling))

    total_bytes = x_nhwc.size * itemsize

    # NOTE: for very small C (s*C < 128, e.g. the toy self-test) the per-hr
    # stores are masked partial writes; that regime is perf-irrelevant and a
    # pure copy beats an in-kernel lane relayout.
    out_flat = pl.pallas_call(
        functools.partial(_reorg_copy_kernel, stride=s, sC=sC),
        out_shape=jax.ShapeDtypeStruct((R, Wo, Co), x_nhwc.dtype),
        grid_spec=pltpu.PrefetchScalarGridSpec(
            num_scalar_prefetch=0,
            grid=(num_steps,),
            in_specs=[
                pl.BlockSpec((TR, s, Wo, sC), lambda r: (r, 0, 0, 0)),
            ],
            out_specs=pl.BlockSpec((TR, Wo, Co), lambda r: (r, 0, 0)),
        ),
        compiler_params=pltpu.CompilerParams(
            dimension_semantics=("parallel",),
            vmem_limit_bytes=vmem_limit),
        cost_estimate=pl.CostEstimate(
            flops=0, transcendentals=0, bytes_accessed=2 * total_bytes),
    )(x_flat)

    return out_flat.reshape(B, Ho, Wo, Co)


def reorg(x_nchw, stride=2):
    """PyTorch-parity Reorg (NCHW in / NCHW out), matching the nn.Module.

    The two transposes are plain-JAX layout glue required only to match the
    PyTorch NCHW API; in an NHWC pipeline call reorg_nhwc directly and they
    disappear (they dominate the end-to-end HBM bytes for NCHW callers).
    """
    assert x_nchw.ndim == 4
    B, C, H, W = x_nchw.shape
    s = int(stride)
    assert H % s == 0 and W % s == 0
    x_nhwc = jnp.transpose(x_nchw, (0, 2, 3, 1))      # (B, H, W, C)
    out_nhwc = reorg_nhwc(x_nhwc, stride=s)           # (B, Ho, Wo, s*s*C)
    return jnp.transpose(out_nhwc, (0, 3, 1, 2))      # (B, s*s*C, Ho, Wo)


def reorg_reference(x, stride=2):
    """Pure-JAX mirror of the PyTorch Reorg.forward (for verification)."""
    B, C, H, W = x.shape
    s = stride
    xr = x.reshape(B, C, H // s, s, W // s, s)
    xr = jnp.transpose(xr, (0, 3, 5, 1, 2, 4))        # (B, hr, wr, C, Ho, Wo)
    return xr.reshape(B, s * s * C, H // s, W // s)


if __name__ == "__main__":
    key = jax.random.PRNGKey(0)
    k1, k2, k3 = jax.random.split(key, 3)
    stride = 2

    # 1) Small shape matching the module's toy usage (lane-sparse but correct).
    B, C, H, W = 2, 4, 16, 16
    x = jax.random.normal(k1, (B, C, H, W), dtype=jnp.float32)
    out = jax.block_until_ready(reorg(x, stride=stride))
    ref = reorg_reference(x, stride=stride)
    assert out.shape == (B, stride * stride * C, H // stride, W // stride), out.shape
    assert out.dtype == x.dtype
    if not bool(jnp.array_equal(out, ref)):
        raise AssertionError("Pallas Reorg (f32, small) does not match reference")

    # 2) Lane-dense, packed-dtype check (C >= 64, bf16): s*C = 128 so the
    #    kernel's stores are full-width unmasked vst.
    B2, C2, H2, W2 = 2, 64, 16, 128
    x2 = jax.random.normal(k2, (B2, C2, H2, W2), dtype=jnp.float32).astype(jnp.bfloat16)
    out2 = jax.block_until_ready(reorg(x2, stride=stride))
    ref2 = reorg_reference(x2, stride=stride)
    assert out2.shape == (B2, stride * stride * C2, H2 // stride, W2 // stride)
    assert out2.dtype == x2.dtype
    if not bool(jnp.array_equal(out2, ref2)):
        raise AssertionError("Pallas Reorg (bf16, lane-dense) does not match reference")

    # 3) Darknet-like odd spatial (Ho = Wo = 13): exercises the non-divisible
    #    grid (cdiv + clipped boundary block) introduced by the perf review.
    B3, C3, H3, W3 = 1, 32, 26, 26
    x3 = jax.random.normal(k3, (B3, C3, H3, W3), dtype=jnp.float32)
    out3 = jax.block_until_ready(reorg(x3, stride=stride))
    ref3 = reorg_reference(x3, stride=stride)
    assert out3.shape == (B3, stride * stride * C3, H3 // stride, W3 // stride)
    if not bool(jnp.array_equal(out3, ref3)):
        raise AssertionError("Pallas Reorg (odd spatial, boundary block) mismatch")

    print("KERNEL_OK")
</pallas_src>

<mosaic_0001>
module attributes {stable_mosaic.version = 11 : i64} {
  func.func @_reorg_copy_kernel(%arg0: i32, %arg1: memref<2x2x8x8xf32, #tpu.memory_space<vmem>>, %arg2: memref<2x8x16xf32, #tpu.memory_space<vmem>>) attributes {dimension_semantics = [#tpu.dimension_semantics<parallel>], iteration_bounds = array<i64: 8>, scalar_prefetch = 0 : i64, scratch_operands = 0 : i64, tpu.core_type = #tpu.core_type<tc>, window_params = [{transform_indices = @transform_0, window_bounds = array<i64: 2, 2, 8, 8>}, {transform_indices = @transform_1, window_bounds = array<i64: 2, 8, 16>}]} {
    %c0 = arith.constant 0 : index
    %c0_0 = arith.constant 0 : index
    %c0_1 = arith.constant 0 : index
    %c0_2 = arith.constant 0 : index
    %0 = vector.load %arg1[%c0, %c0_0, %c0_1, %c0_2] : memref<2x2x8x8xf32, #tpu.memory_space<vmem>>, vector<2x1x8x8xf32>
    %1 = vector.shape_cast %0 : vector<2x1x8x8xf32> to vector<2x8x8xf32>
    %c0_3 = arith.constant 0 : index
    %c0_4 = arith.constant 0 : index
    %c0_5 = arith.constant 0 : index
    %2 = vector.load %arg2[%c0_3, %c0_4, %c0_5] : memref<2x8x16xf32, #tpu.memory_space<vmem>>, vector<2x8x8xf32>
    tpu.vector_store %arg2[%c0_3, %c0_4, %c0_5], %1 {strides = array<i32>} : memref<2x8x16xf32, #tpu.memory_space<vmem>>, vector<2x8x8xf32>,
    %c0_6 = arith.constant 0 : index
    %c1 = arith.constant 1 : index
    %c0_7 = arith.constant 0 : index
    %c0_8 = arith.constant 0 : index
    %3 = vector.load %arg1[%c0_6, %c1, %c0_7, %c0_8] : memref<2x2x8x8xf32, #tpu.memory_space<vmem>>, vector<2x1x8x8xf32>
    %4 = vector.shape_cast %3 : vector<2x1x8x8xf32> to vector<2x8x8xf32>
    %c0_9 = arith.constant 0 : index
    %c0_10 = arith.constant 0 : index
    %c8 = arith.constant 8 : index
    %5 = vector.load %arg2[%c0_9, %c0_10, %c8] : memref<2x8x16xf32, #tpu.memory_space<vmem>>, vector<2x8x8xf32>
    tpu.vector_store %arg2[%c0_9, %c0_10, %c8], %4 {strides = array<i32>} : memref<2x8x16xf32, #tpu.memory_space<vmem>>, vector<2x8x8xf32>,
    return
  }
  func.func @transform_0(%arg0: i32) -> (i32, i32, i32, i32) {
    %c0_i32 = arith.constant 0 : i32
    %c0_i32_0 = arith.constant 0 : i32
    %c0_i32_1 = arith.constant 0 : i32
    %c0_i32_2 = arith.constant 0 : i32
    return %arg0, %c0_i32, %c0_i32_0, %c0_i32_1 : i32, i32, i32, i32
  }
  func.func @transform_1(%arg0: i32) -> (i32, i32, i32) {
    %c0_i32 = arith.constant 0 : i32
    %c0_i32_0 = arith.constant 0 : i32
    %c0_i32_1 = arith.constant 0 : i32
    return %arg0, %c0_i32, %c0_i32_0 : i32, i32, i32
  }
}

</mosaic_0001>

<bundles_post_ra>
// kernel: tpu_custom_call.1
= control target key start
LH: loop header
LB: loop body
LE: loop exit
PB: predicated region body
PF: predicated region fallthrough
CT: control target
= control target key end

     0   :  { %6 = vsyncpa [#allocation3], 0  ;;  %s456_s0 = inlined_call_operand.vmem [shape: f32[16,2,8,8], index: 0, kind: input, shape index: {}]   ;;  %s457_s1 = inlined_call_operand.hbm [shape: f32[16,8,16], index: 1, kind: output, shape index: {}]  }
   0x1   :  { %8 = vsyncpa [#allocation3 + $0x1], 0  ;;  %s351_s6 = smov 0   ;;  %s353_s7 = smov 0  }
   0x2   :  { %s355_s8 = smov 0   ;;  %s357_s9 = smov 0  }
   0x3 LB: > { %s372_s10 = sadd.s32 4294967295, %s336_s9   ;;  %s216_s11 = sadd.s32 4294967294, %s336_s9   ;;  %s336_s9 = sphi %s357_s9, %s463_s9   ;;  %s332_s8 = sphi %s355_s8, %s462_s8   ;;  %s328_s7 = sphi %s353_s7, %s461_s7   ;;  %s324_s6 = sphi %s351_s6, %s460_s6  }
   0x4   : > { %s376_s12 = sadd.s32 1, %s336_s9   ;;  %s47_s13 = sadd.s32 1, %s332_s8 }
   0x5   : > { %s44_s14 = ssub.s32 %s336_s9, %s376_s12  ;;  %p57_p0 = scmp.ne.s32.totalorder %s332_s8, %s328_s7 }
   0x6   : > { %p45_p1 = scmp.eq.s32.totalorder %s44_s14, 0  ;;  %p58_p2 = scmp.eq.s32.totalorder %s372_s10, 7 }
   0x7   : > { %p63_p3 = scmp.ne.s32.totalorder %s328_s7, %s324_s6  ;;  %p64_p4 = scmp.eq.s32.totalorder %s216_s11, 7 }
   0x8   : > { %s387_s15 = scalar_select %p45_p1, %s332_s8, %s47_s13  }
   0x9   : > { %p389_p5 = por %p58_p2, %p57_p0  ;;  %p393_p6 = por %p64_p4, %p63_p3 }
   0xa   : > { %p219_p7 = scmp.ge.s32.totalorder %s336_s9, 1  ;;  %p92_p8 = scmp.lt.s32.totalorder %s336_s9, 9 }
   0xc   : > { %p93_p9 = pnand %p219_p7, %p92_p8 }
   0xd   : > { %s221_s18 = sshll.u32 (!%p93_p9), %s372_s10, 1  ;;  %s110_s19 = sand.u32 (!%p93_p9), 1, %s328_s7   ;;  %vm123_vm0 = vcmask (!%p93_p9), 64512   ;;  %vm137_vm1 = vcmask (!%p93_p9), 130112  }
   0xe   : > { %96 = sbr.rel (%p93_p9) target bundleno = 159 (0x9f), region = 24  ;;  %p114_p10 = scmp.lt.s32.totalorder (!%p93_p9), %s221_s18, 15 }
   0xf   : > { %s220_s20 = sshll.u32 (!%p93_p9), %s110_s19, 4  ;;  %s338_s25 = smov (!%p93_p9), 8  }
  0x10   : > { %s112_s26 = scalar_lea.vmem (!%p93_p9), [#allocation2], %s220_s20  ;;  %s232_s27 = sshll.u32 (!%p93_p9), %s372_s10, 8 }
  0x11   : > { %s154_s28 = sshll.u32 (!%p93_p9), %s112_s26, 4  ;;  %s410_s2 = scalar_lea.hbm (!%p93_p9), %s457_s1, %s232_s27  ;;  %s412_s28 = int_to_ptr.vmem [resolvable:$true] %s154_s28 }
  0x12   : > { %s414_s3 = scalar_lea.sflag (!%p93_p9), [#allocation3], %s110_s19  ;;  %s274_s4 = scalar_lea.vmem (!%p93_p9), %s412_s28, 256 }
  0x13   : > { %p275_p11 = scmp.ne.s32.totalorder (!%p93_p9), %s412_s28, %s274_s4  ;;  %s339_s5 = smov (!%p93_p9), [#allocation2]  }
  0x14   : > { %s278_s10 = sshll.u32 (!%p93_p9), %s339_s5, 4  ;;  %s279_s10 = int_to_ptr.vmem [resolvable:$false] %s278_s10 }
  0x15   : > { %s465_s18 = smov (!%p114_p10, %s221_s18), 15  ;;  %p276_p12 = pnand %p275_p11, %p389_p5 }
  0x16   : > { %s231_s21 = sshll.u32 %s465_s18, 4  ;;  %s280_s11 = scalar_lea.vmem %s279_s10, 512 }
  0x17   : > { %s118_s24 = scalar_lea.vmem %s456_s0, %s231_s21  ;;  %p277_p13 = pneg %p276_p12 }
  0x18   : > { %v224_v0 = vld [vmem:[%s118_s24 + $0x8] sm:$0xff]  ;;  %v121_v1 = vld [vmem:[%s118_s24] sm:$0xff]  ;;  %v122_v2 = vld [vmem:[%s118_s24 + $0x10] sm:$0xff]  ;;  %p281_p0 = scmp.lt.s32.totalorder %s412_s28, %s279_s10  ;;  %p282_p1 = scmp.lt.s32.totalorder %s280_s11, %s274_s4 }
  0x19   : > { %131 = vrot.lane.b32.xlu0 %v224_v0, %s338_s25  ;;  %124 = vst.msk [vmem:[%s112_s26] sm:$0xff] %vm123_vm0, %v121_v1  ;;  %125 = vst.msk [vmem:[%s112_s26 + $0x8] sm:$0xff] %vm123_vm0, %v122_v2  ;;  %v225_v3 = vld [vmem:[%s118_s24 + $0x18] sm:$0xff] }
  0x1a   : > { %p283_p2 = por %p282_p1, %p281_p0 }
  0x1c   : > { %p284_p3 = pnand %p283_p2, %p277_p13 }
  0x1d   : > { %133 = vrot.lane.b32.xlu0 %v225_v3, %s338_s25 }
  0x8b   : > { %v132_v4 = vpop.permute.xlu0 %131 }
  0x8c   : > { %138 = vst.msk [vmem:[%s112_s26] sm:$0xff] %vm137_vm1, %v132_v4 }
  0x8f   : > { %v134_v5 = vpop.permute.xlu0 %133 }
  0x90   : > { %139 = vst.msk [vmem:[%s112_s26 + $0x8] sm:$0xff] %vm137_vm1, %v134_v5 }
  0x91   : > { %287 = shalt.err (!%p284_p3)
}
  0x92   : > { %s288_s13 = scalar_lea.hbm %s410_s2, 256  ;;  %s292_s19 = scalar_lea.hbm %s457_s1, 2048 }
  0x93   : > { %p289_p4 = scmp.ne.s32.totalorder %s410_s2, %s288_s13  ;;  %p293_p9 = scmp.lt.u32.totalorder %s410_s2, %s457_s1 }
  0x94   : > { %p294_p10 = scmp.lt.u32.totalorder %s292_s19, %s288_s13  ;;  %p296_p12 = scmp.lt.u32.totalorder %s288_s13, %s410_s2 }
  0x95   : > { %p290_p7 = pnand %p289_p4, %p389_p5 }
  0x96   : > { %p295_p11 = por %p294_p10, %p293_p9 }
  0x97   : > { %p291_p8 = pneg %p290_p7 }
  0x98   : > { %p297_p13 = por %p296_p12, %p295_p11 }
  0x9a   : > { %p298_p0 = pnand %p297_p13, %p291_p8 }
  0x9c   : > { %301 = shalt.err (!%p298_p0)
}
  0x9d   : > { %s340_s22 = smov 128  }
  0x9e   : > { %233 = dma.vmem_to_hbm [thread:$0]  (%p389_p5), %s412_s28, 256, %s410_s2, %s414_s3, %s340_s22, %s340_s22, %s338_s25  }
  0x9f PF: > { %p239_p1 = scmp.ge.s32.totalorder %s336_s9, 2  ;;  %s169_s23 = sand.u32 1, %s324_s6  }
  0xa0   : > { %s170_s24 = scalar_lea.sflag [#allocation3], %s169_s23 }
  0xa1   : > { %p236_p2 = pnand %p239_p1, %p393_p6 }
  0xa3   : > { %319 = dma.done.wait (!%p236_p2), %s170_s24, 256  }
  0xa4   : > { %321 = vsyncadd (!%p236_p2), %s170_s24, 4294967040  ;;  %p11_p3 = scmp.ge.s32.totalorder %s376_s12, 10   ;;  %s460_s6 = smov %s328_s7 }
  0xa5   : > { %s461_s7 = smov %s332_s8  ;;  %s462_s8 = smov %s387_s15 }
  0xa6   : > { %s463_s9 = smov %s376_s12  ;;  %13 = sbr.rel (!%p11_p3) target bundleno = 3 (0x3), region = 60 }
  0xad   :  { %175 = vsyncpa [#allocation3], 1 }
  0xae   :  { %177 = vsyncpa [#allocation3 + $0x1], 1 }

</bundles_post_ra>
